<compile_context>
chip_gen: v5e
topology: v5e:2x2
jax: 0.10.0
libtpu: 0.0.40
codegen_flags: <defaults>
</compile_context>

<pallas_src>
import math

import jax
import jax.numpy as jnp
from jax.experimental import pallas as pl
from jax.experimental.pallas import tpu as pltpu


# --------------------------------- helpers -----------------------------------
def _round_up(x, m):
    return (x + m - 1) // m * m


def _cdiv(a, b):
    return (a + b - 1) // b


def _vmem_budget_bytes():
    """~75% of physical VMEM (v5e/v6e: 128 MiB, v7x: 64 MiB); safe fallback."""
    cap = 64 << 20
    try:
        cap = int(getattr(pltpu.get_tpu_info(), "vmem_capacity_bytes", cap))
    except Exception:
        pass
    return max(32 << 20, (cap * 3) // 4)


def _resident_spec(block_shape, index_map):
    """BlockSpec for an operand whose block never changes across the grid:
    single-buffer it (double-buffering a constant block only wastes VMEM)."""
    try:
        return pl.BlockSpec(block_shape, index_map, pipeline_mode=pl.Buffered(1))
    except (TypeError, AttributeError):
        return pl.BlockSpec(block_shape, index_map)


# --------------------------------- kernels -----------------------------------
def _fused_kernel(x_ref, w_ref, b_ref, o_ref):
    # logits = x @ W^T + b : bf16 operands on the MXU, f32 accumulation.
    logits = jnp.dot(x_ref[...], w_ref[...], preferred_element_type=jnp.float32)
    logits = logits + b_ref[...]                       # padded lanes carry bias=-1e30
    # log_softmax over the lane axis, all math in f32.
    m = jnp.max(logits, axis=-1, keepdims=True)
    lse = m + jnp.log(jnp.sum(jnp.exp(logits - m), axis=-1, keepdims=True))
    o_ref[...] = logits - lse


def _streaming_kernel(x_ref, w_ref, b_ref, o_ref, m_ref, l_ref):
    # grid = (row_tiles, 2 passes, vocab_tiles)
    #   pass 0: online max / sum-of-exp over the vocab tiles (no output written)
    #   pass 1: recompute the logits tile and write logits - logsumexp
    p = pl.program_id(1)
    j = pl.program_id(2)

    @pl.when((p == 0) & (j == 0))
    def _init():
        m_ref[...] = jnp.full(m_ref.shape, -jnp.inf, m_ref.dtype)
        l_ref[...] = jnp.zeros(l_ref.shape, l_ref.dtype)

    logits = jnp.dot(x_ref[...], w_ref[...], preferred_element_type=jnp.float32)
    logits = logits + b_ref[...]                       # padded lanes carry bias=-1e30

    @pl.when(p == 0)
    def _reduce():
        m_prev = m_ref[...]
        m_new = jnp.maximum(m_prev, jnp.max(logits, axis=-1, keepdims=True))
        l_ref[...] = l_ref[...] * jnp.exp(m_prev - m_new) + jnp.sum(
            jnp.exp(logits - m_new), axis=-1, keepdims=True)
        m_ref[...] = m_new

    @pl.when(p == 1)
    def _write():
        lse = m_ref[...] + jnp.log(l_ref[...])
        o_ref[...] = logits - lse


# -------------------------------- tile planner --------------------------------
def _plan(rows, d_model, vp0, budget, force_mode, row_tile_cap, v_tile_cap):
    """Pick (mode, row_tile, padded_rows, padded_vocab, v_tile) from a VMEM budget."""
    BF16, F32 = 2, 4
    rp8 = _round_up(max(rows, 1), 8)
    hard_cap = int(row_tile_cap) if row_tile_cap else 1024

    def pick_rows(cap):
        cap = max(8, (min(cap, hard_cap) // 8) * 8)
        n_tiles = max(2, _cdiv(rp8, cap))       # >=2 grid steps when rows allow
        row_tile = min(cap, _round_up(_cdiv(rp8, n_tiles), 8))
        return row_tile, _round_up(rp8, row_tile)

    # ---- fused: whole padded vocab resident per row tile ----------------------
    fixed = d_model * vp0 * BF16 + vp0 * F32            # W (single buffer) + bias
    per_row = (2 * d_model * BF16                        # x tile, double-buffered
               + 2 * vp0 * F32                           # out tile, double-buffered
               + 2 * vp0 * F32)                          # f32 logits/exp temporaries
    cap_fused = (budget - fixed) // per_row if budget > fixed else 0
    if force_mode == "fused" or (force_mode is None and cap_fused >= 8):
        row_tile, rp = pick_rows(max(cap_fused, 8))
        return "fused", row_tile, rp, vp0, vp0

    # ---- streaming: vocab tiled, two-pass online log-softmax ------------------
    v_tile = min(vp0, int(v_tile_cap) if v_tile_cap else 2048)
    v_tile = max(128, (v_tile // 128) * 128)
    while True:
        fixed = 2 * d_model * v_tile * BF16 + 2 * v_tile * F32
        per_row = 2 * d_model * BF16 + 2 * v_tile * F32 + 2 * v_tile * F32 + 2 * F32
        cap = (budget - fixed) // per_row if budget > fixed else 0
        if cap >= 8 or v_tile == 128:
            break
        v_tile = max(128, ((v_tile // 2) // 128) * 128)
    row_tile, rp = pick_rows(max(cap, 8))
    return "streaming", row_tile, rp, _round_up(vp0, v_tile), v_tile


# ---------------------------------- wrapper -----------------------------------
def generator_forward(x, weight, bias, *, force_mode=None, row_tile_cap=None,
                      v_tile_cap=None):
    """log_softmax(x @ weight.T + bias, axis=-1)  (Generator.forward).

    x: (..., d_model); weight: (vocab, d_model); bias: (vocab,) -> f32 (..., vocab)
    """
    *lead, d_model = x.shape
    vocab = weight.shape[0]
    assert weight.shape == (vocab, d_model)
    assert bias.shape == (vocab,)

    rows = int(math.prod(lead)) if lead else 1
    vp0 = _round_up(vocab, 128)
    budget = _vmem_budget_bytes()
    mode, row_tile, rp, vp, v_tile = _plan(
        rows, d_model, vp0, budget, force_mode, row_tile_cap, v_tile_cap)

    # Activations: fold leading dims, cast bf16; pad rows only when needed.
    x2 = x.reshape(rows, d_model).astype(jnp.bfloat16)
    if rp != rows:
        x2 = jnp.zeros((rp, d_model), jnp.bfloat16).at[:rows].set(x2)

    # Weight: (vocab, d_model) -> lane-dense (d_model, vp) bf16.
    # TODO(synk): in a real model, pre-store the LM head transposed/padded in bf16 so
    # this transpose+pad is not re-materialized per call (here jit fuses/folds it).
    w_t = weight.T.astype(jnp.bfloat16)
    if vp != vocab:
        w_t = jnp.zeros((d_model, vp), jnp.bfloat16).at[:, :vocab].set(w_t)

    # Bias in f32 with the pad mask baked in: padded lanes get -1e30, so they never
    # win the row max and contribute exactly 0 to the sum-of-exp (no in-kernel mask).
    b_p = jnp.full((1, vp), -1e30, jnp.float32).at[0, :vocab].set(
        bias.astype(jnp.float32))

    if mode == "fused":
        out = pl.pallas_call(
            _fused_kernel,
            out_shape=jax.ShapeDtypeStruct((rp, vp), jnp.float32),
            grid_spec=pltpu.PrefetchScalarGridSpec(
                num_scalar_prefetch=0,
                grid=(rp // row_tile,),
                in_specs=[
                    pl.BlockSpec((row_tile, d_model), lambda i: (i, 0)),
                    _resident_spec((d_model, vp), lambda i: (0, 0)),
                    _resident_spec((1, vp), lambda i: (0, 0)),
                ],
                out_specs=pl.BlockSpec((row_tile, vp), lambda i: (i, 0)),
            ),
            compiler_params=pltpu.CompilerParams(
                dimension_semantics=("parallel",),
                vmem_limit_bytes=budget),
        )(x2, w_t, b_p)
    else:
        out = pl.pallas_call(
            _streaming_kernel,
            out_shape=jax.ShapeDtypeStruct((rp, vp), jnp.float32),
            grid_spec=pltpu.PrefetchScalarGridSpec(
                num_scalar_prefetch=0,
                grid=(rp // row_tile, 2, vp // v_tile),
                in_specs=[
                    pl.BlockSpec((row_tile, d_model), lambda i, p, j: (i, 0)),
                    pl.BlockSpec((d_model, v_tile), lambda i, p, j: (0, j)),
                    pl.BlockSpec((1, v_tile), lambda i, p, j: (0, j)),
                ],
                # pass 0 parks the (unwritten) output buffer on block (i, 0);
                # pass 1 walks (i, j) and writes the final log-probs.  Every output
                # block index forms one contiguous run, so there is no revisit.
                out_specs=pl.BlockSpec((row_tile, v_tile),
                                       lambda i, p, j: (i, j * p)),
                scratch_shapes=[pltpu.VMEM((row_tile, 1), jnp.float32),   # running max
                                pltpu.VMEM((row_tile, 1), jnp.float32)],  # running sum
            ),
            compiler_params=pltpu.CompilerParams(
                dimension_semantics=("parallel", "arbitrary", "arbitrary"),
                vmem_limit_bytes=budget),
        )(x2, w_t, b_p)

    out = out[:rows, :vocab]
    return out.reshape(tuple(lead) + (vocab,))


# ------------------------------------ main ------------------------------------
if __name__ == "__main__":
    key = jax.random.PRNGKey(0)
    kx, kw, kb, kx2, kw2, kb2 = jax.random.split(key, 6)

    fwd = jax.jit(generator_forward,
                  static_argnames=("force_mode", "row_tile_cap", "v_tile_cap"))

    def reference(x, w, b):
        # Same math as the kernel: bf16 operands, f32 accumulate + f32 log-softmax.
        logits = jnp.dot(x.astype(jnp.bfloat16).reshape(-1, x.shape[-1]),
                         w.T.astype(jnp.bfloat16),
                         preferred_element_type=jnp.float32) + b.astype(jnp.float32)
        return jax.nn.log_softmax(logits, axis=-1).reshape(*x.shape[:-1], w.shape[0])

    # ---- test 1: default (fused, whole-vocab-resident) path -------------------
    B, T, D_MODEL, VOCAB = 2, 8, 32, 50
    bound = 1.0 / math.sqrt(D_MODEL)
    x = jax.random.normal(kx, (B, T, D_MODEL), jnp.float32)
    weight = jax.random.uniform(kw, (VOCAB, D_MODEL), jnp.float32, -bound, bound)
    bias = jax.random.uniform(kb, (VOCAB,), jnp.float32, -bound, bound)

    out = jax.block_until_ready(fwd(x, weight, bias))
    ref = reference(x, weight, bias)
    assert out.shape == (B, T, VOCAB), out.shape
    assert bool(jnp.all(jnp.isfinite(out)))
    assert bool(jnp.allclose(out, ref, atol=1e-4, rtol=1e-4))
    # loose sanity check against the full-f32 math (bounds the bf16 matmul error)
    ref32 = jax.nn.log_softmax(jnp.einsum("btd,vd->btv", x, weight) + bias, axis=-1)
    assert bool(jnp.allclose(out, ref32, atol=5e-2, rtol=5e-2))

    # ---- test 2: force the vocab-tiled streaming (online log-softmax) path ----
    VOCAB2 = 300
    x2 = jax.random.normal(kx2, (B, T, D_MODEL), jnp.float32)
    weight2 = jax.random.uniform(kw2, (VOCAB2, D_MODEL), jnp.float32, -bound, bound)
    bias2 = jax.random.uniform(kb2, (VOCAB2,), jnp.float32, -bound, bound)

    out2 = jax.block_until_ready(
        fwd(x2, weight2, bias2, force_mode="streaming", v_tile_cap=128))
    ref2 = reference(x2, weight2, bias2)
    assert out2.shape == (B, T, VOCAB2), out2.shape
    assert bool(jnp.all(jnp.isfinite(out2)))
    assert bool(jnp.allclose(out2, ref2, atol=1e-4, rtol=1e-4))

    print("KERNEL_OK")
</pallas_src>

<mosaic_0001>
module attributes {stable_mosaic.version = 11 : i64} {
  func.func @_fused_kernel(%arg0: i32, %arg1: memref<8x32xbf16, #tpu.memory_space<vmem>>, %arg2: memref<32x128xbf16, #tpu.memory_space<vmem>>, %arg3: memref<1x128xf32, #tpu.memory_space<vmem>>, %arg4: memref<8x128xf32, #tpu.memory_space<vmem>>) attributes {dimension_semantics = [#tpu.dimension_semantics<parallel>], iteration_bounds = array<i64: 2>, scalar_prefetch = 0 : i64, scratch_operands = 0 : i64, tpu.core_type = #tpu.core_type<tc>, window_params = [{transform_indices = @transform_0, window_bounds = array<i64: 8, 32>}, {pipeline_mode = #tpu.pipeline_mode<synchronous>, transform_indices = @transform_1, window_bounds = array<i64: 32, 128>}, {pipeline_mode = #tpu.pipeline_mode<synchronous>, transform_indices = @transform_2, window_bounds = array<i64: 1, 128>}, {transform_indices = @transform_3, window_bounds = array<i64: 8, 128>}]} {
    %c0 = arith.constant 0 : index
    %c0_0 = arith.constant 0 : index
    %0 = vector.load %arg1[%c0, %c0_0] : memref<8x32xbf16, #tpu.memory_space<vmem>>, vector<8x32xbf16>
    %c0_1 = arith.constant 0 : index
    %c0_2 = arith.constant 0 : index
    %1 = vector.load %arg2[%c0_1, %c0_2] : memref<32x128xbf16, #tpu.memory_space<vmem>>, vector<32x128xbf16>
    %cst = arith.constant dense<0.000000e+00> : vector<8x128xf32>
    %2 = tpu.matmul %0, %1, %cst {dimension_numbers = #tpu.dot_dimension_numbers<[1], [0], [0], [1], [0, 0, 1, 1], [], []>} : vector<8x32xbf16>, vector<32x128xbf16>, vector<8x128xf32> -> vector<8x128xf32>
    %c0_3 = arith.constant 0 : index
    %c0_4 = arith.constant 0 : index
    %3 = vector.load %arg3[%c0_3, %c0_4] : memref<1x128xf32, #tpu.memory_space<vmem>>, vector<1x128xf32>
    %4 = vector.broadcast %3 : vector<1x128xf32> to vector<8x128xf32>
    %5 = arith.addf %2, %4 : vector<8x128xf32>
    %cst_5 = arith.constant dense<0xFF800000> : vector<8xf32>
    %6 = vector.multi_reduction <maximumf>, %5, %cst_5 [1] : vector<8x128xf32> to vector<8xf32>
    %7 = vector.shape_cast %6 : vector<8xf32> to vector<8x1xf32>
    %8 = vector.broadcast %7 : vector<8x1xf32> to vector<8x128xf32>
    %9 = arith.subf %5, %8 : vector<8x128xf32>
    %10 = math.exp %9 : vector<8x128xf32>
    %cst_6 = arith.constant dense<0.000000e+00> : vector<8xf32>
    %11 = vector.multi_reduction <add>, %10, %cst_6 [1] : vector<8x128xf32> to vector<8xf32>
    %12 = vector.shape_cast %11 : vector<8xf32> to vector<8x1xf32>
    %13 = math.log %12 : vector<8x1xf32>
    %14 = arith.addf %7, %13 : vector<8x1xf32>
    %15 = vector.broadcast %14 : vector<8x1xf32> to vector<8x128xf32>
    %16 = arith.subf %5, %15 : vector<8x128xf32>
    %c0_7 = arith.constant 0 : index
    %c0_8 = arith.constant 0 : index
    %17 = vector.load %arg4[%c0_7, %c0_8] : memref<8x128xf32, #tpu.memory_space<vmem>>, vector<8x128xf32>
    tpu.vector_store %arg4[%c0_7, %c0_8], %16 {strides = array<i32>} : memref<8x128xf32, #tpu.memory_space<vmem>>, vector<8x128xf32>,
    return
  }
  func.func @transform_0(%arg0: i32) -> (i32, i32) {
    %c0_i32 = arith.constant 0 : i32
    %c0_i32_0 = arith.constant 0 : i32
    return %arg0, %c0_i32 : i32, i32
  }
  func.func @transform_1(%arg0: i32) -> (i32, i32) {
    %c0_i32 = arith.constant 0 : i32
    %c0_i32_0 = arith.constant 0 : i32
    %c0_i32_1 = arith.constant 0 : i32
    return %c0_i32, %c0_i32_0 : i32, i32
  }
  func.func @transform_2(%arg0: i32) -> (i32, i32) {
    %c0_i32 = arith.constant 0 : i32
    %c0_i32_0 = arith.constant 0 : i32
    %c0_i32_1 = arith.constant 0 : i32
    return %c0_i32, %c0_i32_0 : i32, i32
  }
  func.func @transform_3(%arg0: i32) -> (i32, i32) {
    %c0_i32 = arith.constant 0 : i32
    %c0_i32_0 = arith.constant 0 : i32
    return %arg0, %c0_i32 : i32, i32
  }
}

</mosaic_0001>

<bundles_post_ra>
// kernel: generator_forward.1
= control target key start
LH: loop header
LB: loop body
LE: loop exit
PB: predicated region body
PF: predicated region fallthrough
CT: control target
= control target key end

     0   :  { %s331_s12 = smov 0   ;;  %s357_s0 = inlined_call_operand.vmem [shape: bf16[16,32], index: 0, kind: input, shape index: {}]   ;;  %s358_s1 = inlined_call_operand.vmem [shape: bf16[32,128], index: 1, kind: input, shape index: {}]   ;;  %s359_s2 = inlined_call_operand.vmem [shape: f32[1,128], index: 2, kind: input, shape index: {}]   ;;  %s360_s3 = inlined_call_operand.vmem [shape: f32[16,128], index: 3, kind: output, shape index: {}]  }
   0x1 LB: > { %s270_s13 = sadd.s32 4294967295, %s309_s12   ;;  %p274_p0 = scmp.ge.s32.totalorder %s309_s12, 1  ;;  %s309_s12 = sphi %s331_s12, %s13_s12  }
   0x2   : > { %p136_p1 = scmp.lt.s32.totalorder %s309_s12, 3 }
   0x4   : > { %p137_p2 = pnand %p274_p0, %p136_p1 }
   0x5   : > { %p158_p3 = scmp.lt.s32.totalorder (!%p137_p2), %s270_s13, 1 }
   0x6   : > { %140 = sbr.rel (%p137_p2) target bundleno = 404 (0x194), region = 32 }
   0xb   : > { %v289_v0 = vld [vmem:[%s358_s1 + $0x8] sm:$0xff]  ;;  %v288_v1 = vld [vmem:[%s358_s1] sm:$0xff]  ;;  %s362_s13 = smov (!%p158_p3, %s270_s13), 1  ;;  %vm188_vm0 = vcmask 261120  }
   0xc   : > { %198 = vmatpush.bf16.msra.mxu0 %v289_v0  ;;  %s275_s18 = sshll.u32 %s362_s13, 2  ;;  %v298_v3 = vld [vmem:[%s359_s2] ss:$0 sm:$0xff]  ;;  %s276_s24 = sshll.u32 %s362_s13, 3 }
   0xd   : > { %s161_s21 = scalar_lea.vmem %s357_s0, %s275_s18  ;;  %s165_s27 = scalar_lea.vmem %s360_s3, %s276_s24 }
   0xe   : > { %v167_v2 = vld [vmem:[%s161_s21] sm:$0xf] }
  0x10   : > { %199 = vmatpush.bf16.msra.mxu0 %v288_v1 }
  0x13   : > { %285 = vmatmul.msk.bf16.vlgmr.msra.gmra.mxu0 %vm188_vm0, %v167_v2 }
  0x90   : > { %v201_v4 = vpop.f32.mrf.mxu0 }
  0x91   : > { %v202_v5 = vadd.f32 %v298_v3, %v201_v4 }
  0x93   : > { %205 = vmax.xlane.f32.xlu0 %v202_v5 }
  0x98   : > { %v203_v6 = vpop.f32.mrf.mxu0 }
 0x106   : > { %v206_v7 = vpop.xlane.xlu0 %205 }
 0x107   : > { %v207_v8 = vsub.f32 %v202_v5, %v206_v7 }
 0x109   : > { %v208_v9 = vmul.f32 1.442695, %v207_v8 }
 0x10b   : > { %299 = vpow2.f32 %v208_v9 }
 0x111   : > { %v300_v10 = vpop.eup %299 }
 0x112   : > { %210 = vadd.xlane.f32.xlu0 %v300_v10 }
 0x185   : > { %v211_v11 = vpop.xlane.xlu0 %210 }
 0x186   : > { %301 = vlog2.f32 %v211_v11 }
 0x18c   : > { %v302_v12 = vpop.eup %301 }
 0x18d   : > { %v213_v13 = vmul.f32 0.6931472, %v302_v12 }
 0x18f   : > { %v214_v14 = vadd.f32 %v213_v13, %v206_v7 }
 0x191   : > { %v215_v15 = vsub.f32 %v202_v5, %v214_v14 }
 0x193   : > { %216 = vst [vmem:[%s165_s27] sm:$0xff] %v215_v15 }
 0x194 PF: > { %s13_s12 = sadd.s32 1, %s309_s12  }
 0x195   : > { %p10_p4 = scmp.ge.s32.totalorder %s13_s12, 4  }
 0x197   :  { %12 = sbr.rel (!%p10_p4) target bundleno = 1 (0x1), region = 62 }

</bundles_post_ra>
